<compile_context>
chip_gen: v7x
topology: tpu7x:2x2x1
jax: 0.10.0
libtpu: 0.0.40
codegen_flags: <defaults>
</compile_context>

<pallas_src>
import functools

import jax
import jax.numpy as jnp
from jax import lax
from jax.experimental import pallas as pl
from jax.experimental.pallas import tpu as pltpu


# ----------------------------- Pallas kernel --------------------------------

def _ln_linear_kernel(z_ref, w_ref, b_ref, o_ref, *, eps):
    """One (TM, D) row tile: f32 LayerNorm stats, bf16 MXU matmul, f32 accumulate.

    gamma/beta are pre-folded into w_ref / b_ref by the wrapper, so the kernel
    only centers/scales, contracts, and adds the folded bias.
    """
    x = z_ref[...]                                      # (TM, D) f32
    mean = jnp.mean(x, axis=-1, keepdims=True)
    xc = x - mean
    var = jnp.mean(xc * xc, axis=-1, keepdims=True)     # biased variance (PyTorch LN)
    inv = lax.rsqrt(var + eps)
    xn = (xc * inv).astype(jnp.bfloat16)                # bf16 feed to the MXU
    acc = jnp.dot(xn, w_ref[...], preferred_element_type=jnp.float32)  # (TM, DoutP) f32
    o_ref[...] = (acc + b_ref[...]).astype(o_ref.dtype)


# ----------------------------- Wrapper ---------------------------------------

def _round_up(a, b):
    return -(-a // b) * b


def _vmem_limit_bytes():
    """Generation-aware scoped-VMEM limit (~3/4 of physical VMEM)."""
    try:
        cap = int(pltpu.get_tpu_info().vmem_capacity_bytes)
    except Exception:
        cap = 64 * 1024 * 1024          # assume the smallest (v7x per-TC) VMEM
    # ~96 MiB on v5e/v6e (128 MiB physical), ~48 MiB on v7x (64 MiB physical).
    return min(cap * 3 // 4, 112 * 1024 * 1024)


def _choose_block_rows(M, D, dout_p, vmem_limit):
    """Row-tile size from the VMEM budget; >= 2 grid steps when M allows."""
    # Resident (constant index_map) inputs: bf16 weight + f32 bias, double-buffered.
    resident = 2 * (D * dout_p * 2 + dout_p * 4)
    # Pipelined per-row cost: f32 input tile + f32 output tile, double-buffered.
    per_row = 2 * (D + dout_p) * 4
    budget = max(int(vmem_limit * 0.7) - resident, 1 << 20)
    rows = min(max(budget // per_row, 16), 1024)
    if M >= 32:
        rows = min(rows, -(-M // 2))    # >= 2 grid steps -> both v7x TensorCores busy
    if rows >= M:
        return M                        # single full-extent block
    if rows >= 256:
        rows = rows // 128 * 128        # fill 256x256 MXU passes / lane alignment
    elif rows >= 16:
        rows = rows // 16 * 16          # bf16 sublane packing
    else:
        rows = max(rows // 8 * 8, 8)
    return rows


def fused_layernorm_linear(z, w_fold_bf16, bias_f32, *, eps=1e-5, block_rows=None):
    """z: (M, D) f32; w_fold_bf16: (D, DoutP) bf16; bias_f32: (1, DoutP) f32."""
    M, D = z.shape
    dout_p = w_fold_bf16.shape[1]
    vmem_limit = _vmem_limit_bytes()
    if block_rows is None:
        block_rows = _choose_block_rows(M, D, dout_p, vmem_limit)

    grid = (pl.cdiv(M, block_rows),)    # ragged last block handled by Pallas

    return pl.pallas_call(
        functools.partial(_ln_linear_kernel, eps=eps),
        out_shape=jax.ShapeDtypeStruct((M, dout_p), z.dtype),
        grid=grid,
        in_specs=[
            pl.BlockSpec((block_rows, D), lambda i: (i, 0)),   # activation row tiles
            pl.BlockSpec((D, dout_p), lambda i: (0, 0)),       # resident bf16 weight
            pl.BlockSpec((1, dout_p), lambda i: (0, 0)),       # resident f32 bias
        ],
        out_specs=pl.BlockSpec((block_rows, dout_p), lambda i: (i, 0)),
        compiler_params=pltpu.CompilerParams(
            dimension_semantics=("parallel",),                 # megacore sharding
            vmem_limit_bytes=vmem_limit,
        ),
    )(z, w_fold_bf16, bias_f32)


def patch_merging_forward(params, x, *, eps=1e-5):
    """PatchMerging.forward: x (B, C, H, W) -> (B, ratio*C, H/2, W/2)."""
    B, C, H, W = x.shape
    assert H % 2 == 0 and W % 2 == 0, f"x size ({H}*{W}) are not even."
    H2, W2 = H // 2, W // 2
    D = 4 * C

    w = params["reduction_w"]                       # (ratio*C, 4C), nn.Linear layout
    dout = w.shape[0]
    gamma = params["norm_gamma"].astype(jnp.float32)
    beta = params["norm_beta"].astype(jnp.float32)

    # Fold LayerNorm affine into the linear:  (xn*g + b) @ W^T = xn @ (g ⊙ W^T) + b @ W^T
    w_t = jnp.transpose(w).astype(jnp.float32)      # (4C, ratio*C)
    w_fold = gamma[:, None] * w_t                   # (4C, ratio*C) f32
    bias = beta @ w_t                               # (ratio*C,)    f32

    # Lane-dense output: pad Dout to a multiple of 128 with zero columns.
    dout_p = _round_up(dout, 128)
    if dout_p != dout:
        w_fold = jnp.pad(w_fold, ((0, 0), (0, dout_p - dout)))
        bias = jnp.pad(bias, (0, dout_p - dout))
    w_fold = w_fold.astype(jnp.bfloat16)
    bias = bias.reshape(1, dout_p)

    # Stride-2 patch gather + channel concat (one XLA copy, pure data movement).
    # TODO(synk): fuse this gather into the kernel input path (see header note).
    x0 = x[:, :, 0::2, 0::2]
    x1 = x[:, :, 1::2, 0::2]
    x2 = x[:, :, 0::2, 1::2]
    x3 = x[:, :, 1::2, 1::2]
    y = jnp.concatenate([x0, x1, x2, x3], axis=1)   # (B, 4C, H2, W2)

    # torch .view(B, -1, 4C): raw row-major reinterpretation (NOT a transpose).
    z = y.reshape(B * H2 * W2, D).astype(jnp.float32)

    out2d = fused_layernorm_linear(z, w_fold, bias, eps=eps)   # (M, dout_p)
    if dout_p != dout:
        out2d = out2d[:, :dout]

    # torch .view(B, ratio*C, H2, W2): raw row-major reinterpretation.
    return out2d.reshape(B, dout, H2, W2).astype(x.dtype)


# ----------------------------- Pure-JAX reference ----------------------------

def patch_merging_reference(params, x, eps=1e-5):
    B, C, H, W = x.shape
    H2, W2 = H // 2, W // 2
    x0 = x[:, :, 0::2, 0::2]
    x1 = x[:, :, 1::2, 0::2]
    x2 = x[:, :, 0::2, 1::2]
    x3 = x[:, :, 1::2, 1::2]
    y = jnp.concatenate([x0, x1, x2, x3], axis=1).reshape(B, H2 * W2, 4 * C)
    mean = jnp.mean(y, axis=-1, keepdims=True)
    var = jnp.mean((y - mean) ** 2, axis=-1, keepdims=True)
    yn = (y - mean) / jnp.sqrt(var + eps)
    yn = yn * params["norm_gamma"] + params["norm_beta"]
    out = jnp.einsum("bld,od->blo", yn, params["reduction_w"],
                     precision=lax.Precision.HIGHEST)
    return out.reshape(B, params["reduction_w"].shape[0], H2, W2)


# ----------------------------- Main ------------------------------------------

if __name__ == "__main__":
    key = jax.random.PRNGKey(0)
    kx, kw, kg, kb = jax.random.split(key, 4)

    B, C, H, W = 2, 4, 16, 16          # small shapes consistent with the module
    ratio = 2
    D = 4 * C

    x = jax.random.normal(kx, (B, C, H, W), jnp.float32)
    params = {
        # nn.Linear(4C, ratio*C, bias=False) weight, PyTorch layout (out, in)
        "reduction_w": jax.random.normal(kw, (ratio * C, D), jnp.float32)
                       / jnp.sqrt(float(D)),
        # LayerNorm(4C) affine params (non-trivial values for a stronger check)
        "norm_gamma": 1.0 + 0.1 * jax.random.normal(kg, (D,), jnp.float32),
        "norm_beta": 0.05 * jax.random.normal(kb, (D,), jnp.float32),
    }

    fwd = jax.jit(patch_merging_forward)
    out = jax.block_until_ready(fwd(params, x))

    assert out.shape == (B, ratio * C, H // 2, W // 2), out.shape
    assert bool(jnp.all(jnp.isfinite(out)))

    ref = patch_merging_reference(params, x)
    max_err = float(jnp.max(jnp.abs(out - ref)))
    mean_err = float(jnp.mean(jnp.abs(out - ref)))
    # Kernel contracts in bf16 (f32 accumulate); reference is f32 HIGHEST.
    assert max_err < 1e-1 and mean_err < 1e-2, (max_err, mean_err)

    print("KERNEL_OK")
</pallas_src>

<mosaic_0001>
module attributes {stable_mosaic.version = 11 : i64} {
  func.func @_ln_linear_kernel(%arg0: i32, %arg1: memref<64x16xf32, #tpu.memory_space<vmem>>, %arg2: memref<16x128xbf16, #tpu.memory_space<vmem>>, %arg3: memref<1x128xf32, #tpu.memory_space<vmem>>, %arg4: memref<64x128xf32, #tpu.memory_space<vmem>>) attributes {dimension_semantics = [#tpu.dimension_semantics<parallel>], iteration_bounds = array<i64: 2>, scalar_prefetch = 0 : i64, scratch_operands = 0 : i64, tpu.core_type = #tpu.core_type<tc>, window_params = [{transform_indices = @transform_0, window_bounds = array<i64: 64, 16>}, {pipeline_mode = #tpu.pipeline_mode<synchronous>, transform_indices = @transform_1, window_bounds = array<i64: 16, 128>}, {pipeline_mode = #tpu.pipeline_mode<synchronous>, transform_indices = @transform_2, window_bounds = array<i64: 1, 128>}, {transform_indices = @transform_3, window_bounds = array<i64: 64, 128>}]} {
    %c0 = arith.constant 0 : index
    %c0_0 = arith.constant 0 : index
    %0 = vector.load %arg1[%c0, %c0_0] : memref<64x16xf32, #tpu.memory_space<vmem>>, vector<64x16xf32>
    %cst = arith.constant dense<0.000000e+00> : vector<64xf32>
    %1 = vector.multi_reduction <add>, %0, %cst [1] : vector<64x16xf32> to vector<64xf32>
    %2 = vector.shape_cast %1 : vector<64xf32> to vector<64x1xf32>
    %cst_1 = arith.constant 1.600000e+01 : f32
    %3 = vector.broadcast %cst_1 : f32 to vector<64x1xf32>
    %4 = arith.divf %2, %3 : vector<64x1xf32>
    %5 = vector.broadcast %4 : vector<64x1xf32> to vector<64x16xf32>
    %6 = arith.subf %0, %5 : vector<64x16xf32>
    %7 = arith.mulf %6, %6 : vector<64x16xf32>
    %cst_2 = arith.constant dense<0.000000e+00> : vector<64xf32>
    %8 = vector.multi_reduction <add>, %7, %cst_2 [1] : vector<64x16xf32> to vector<64xf32>
    %9 = vector.shape_cast %8 : vector<64xf32> to vector<64x1xf32>
    %cst_3 = arith.constant 1.600000e+01 : f32
    %10 = vector.broadcast %cst_3 : f32 to vector<64x1xf32>
    %11 = arith.divf %9, %10 : vector<64x1xf32>
    %cst_4 = arith.constant 9.99999974E-6 : f32
    %12 = vector.broadcast %cst_4 : f32 to vector<64x1xf32>
    %13 = arith.addf %11, %12 : vector<64x1xf32>
    %14 = math.rsqrt %13 : vector<64x1xf32>
    %15 = vector.broadcast %14 : vector<64x1xf32> to vector<64x16xf32>
    %16 = arith.mulf %6, %15 : vector<64x16xf32>
    %17 = arith.truncf %16 : vector<64x16xf32> to vector<64x16xbf16>
    %c0_5 = arith.constant 0 : index
    %c0_6 = arith.constant 0 : index
    %18 = vector.load %arg2[%c0_5, %c0_6] : memref<16x128xbf16, #tpu.memory_space<vmem>>, vector<16x128xbf16>
    %cst_7 = arith.constant dense<0.000000e+00> : vector<64x128xf32>
    %19 = tpu.matmul %17, %18, %cst_7 {dimension_numbers = #tpu.dot_dimension_numbers<[1], [0], [0], [1], [0, 0, 1, 1], [], []>} : vector<64x16xbf16>, vector<16x128xbf16>, vector<64x128xf32> -> vector<64x128xf32>
    %c0_8 = arith.constant 0 : index
    %c0_9 = arith.constant 0 : index
    %20 = vector.load %arg3[%c0_8, %c0_9] : memref<1x128xf32, #tpu.memory_space<vmem>>, vector<1x128xf32>
    %21 = vector.broadcast %20 : vector<1x128xf32> to vector<64x128xf32>
    %22 = arith.addf %19, %21 : vector<64x128xf32>
    %c0_10 = arith.constant 0 : index
    %c0_11 = arith.constant 0 : index
    %23 = vector.load %arg4[%c0_10, %c0_11] : memref<64x128xf32, #tpu.memory_space<vmem>>, vector<64x128xf32>
    tpu.vector_store %arg4[%c0_10, %c0_11], %22 {strides = array<i32>} : memref<64x128xf32, #tpu.memory_space<vmem>>, vector<64x128xf32>,
    return
  }
  func.func @transform_0(%arg0: i32) -> (i32, i32) {
    %c0_i32 = arith.constant 0 : i32
    %c0_i32_0 = arith.constant 0 : i32
    return %arg0, %c0_i32 : i32, i32
  }
  func.func @transform_1(%arg0: i32) -> (i32, i32) {
    %c0_i32 = arith.constant 0 : i32
    %c0_i32_0 = arith.constant 0 : i32
    %c0_i32_1 = arith.constant 0 : i32
    return %c0_i32, %c0_i32_0 : i32, i32
  }
  func.func @transform_2(%arg0: i32) -> (i32, i32) {
    %c0_i32 = arith.constant 0 : i32
    %c0_i32_0 = arith.constant 0 : i32
    %c0_i32_1 = arith.constant 0 : i32
    return %c0_i32, %c0_i32_0 : i32, i32
  }
  func.func @transform_3(%arg0: i32) -> (i32, i32) {
    %c0_i32 = arith.constant 0 : i32
    %c0_i32_0 = arith.constant 0 : i32
    return %arg0, %c0_i32 : i32, i32
  }
}

</mosaic_0001>

<bundles_post_ra>
// kernel: patch_merging_forward.1
= control target key start
LH: loop header
LB: loop body
LE: loop exit
PB: predicated region body
PF: predicated region fallthrough
CT: control target
= control target key end

     0   :  { %8 = vsyncpa [#allocation3], 0  ;;  %s820_s0 = inlined_call_operand.vmem [shape: f32[128,16], index: 0, kind: input, shape index: {}]   ;;  %s821_s1 = inlined_call_operand.vmem [shape: bf16[16,128], index: 1, kind: input, shape index: {}]   ;;  %s822_s2 = inlined_call_operand.vmem [shape: f32[1,128], index: 2, kind: input, shape index: {}]   ;;  %s823_s3 = inlined_call_operand.hbm [shape: f32[128,128], index: 3, kind: output, shape index: {}]  }
   0x1   :  { %10 = vsyncpa [#allocation3 + $0x1], 0  ;;  %s648_s12 = smov 0   ;;  %s650_s13 = smov 0  }
   0x2   :  { %s652_s14 = smov 0   ;;  %s654_s15 = smov 0  }
   0x3 LB: > { %s669_s16 = sadd.s32 4294967295, %s623_s15   ;;  %s467_s17 = sadd.s32 4294967294, %s623_s15   ;;  %s623_s15 = sphi %s654_s15, %s829_s15   ;;  %s619_s14 = sphi %s652_s14, %s828_s14   ;;  %s615_s13 = sphi %s650_s13, %s827_s13   ;;  %s611_s12 = sphi %s648_s12, %s826_s12  }
   0x4   : > { %s673_s18 = sadd.s32 1, %s623_s15   ;;  %s91_s19 = sadd.s32 1, %s619_s14 }
   0x5   : > { %s88_s20 = ssub.s32 %s623_s15, %s673_s18  ;;  %p101_p0 = scmp.ne.s32.totalorder %s619_s14, %s615_s13 }
   0x6   : > { %p89_p1 = scmp.eq.s32.totalorder %s88_s20, 0  ;;  %p102_p2 = scmp.eq.s32.totalorder %s669_s16, 1 }
   0x7   : > { %p107_p3 = scmp.ne.s32.totalorder %s615_s13, %s611_s12  ;;  %p108_p4 = scmp.eq.s32.totalorder %s467_s17, 1 }
   0x8   : > { %s684_s21 = scalar_select %p89_p1, %s619_s14, %s91_s19  }
   0x9   : > { %p686_p5 = por %p102_p2, %p101_p0  ;;  %p690_p6 = por %p108_p4, %p107_p3 }
   0xa   : > { %p470_p7 = scmp.ge.s32.totalorder %s623_s15, 1  ;;  %p141_p8 = scmp.lt.s32.totalorder %s623_s15, 3 }
   0xc   : > { %p142_p9 = pnand %p470_p7, %p141_p8 }
   0xd   : > { %s472_s24 = sshll.u32 (!%p142_p9), %s669_s16, 3  ;;  %vm181_vm0 = vcmask (!%p142_p9), 130048   ;;  %v544_v56 = vld [vmem:[%s821_s1] sm:$0xff] (!%p142_p9)   ;;  %s162_s4 = sand.u32 (!%p142_p9), 1, %s615_s13  }
   0xe   : > { %145 = sbr.rel (%p142_p9) target bundleno = 584 (0x248), region = 32  ;;  %p166_p10 = scmp.lt.s32.totalorder (!%p142_p9), %s472_s24, 15  ;;  %491 = vmatprep.subr.bf16.mxu0 (!%p142_p9), %v544_v56  ;;  %501 = vmatprep.subr.bf16.mxu1 (!%p142_p9), %v544_v56 }
   0xf   : > { %492 = vmatpush3.bf16.msra.mxu0 (!%p142_p9), %v544_v56  ;;  %502 = vmatpush3.bf16.msra.mxu1 (!%p142_p9), %v544_v56  ;;  %s471_s5 = sshll.u32 (!%p142_p9), %s162_s4, 6  ;;  %s485_s9 = sshll.u32 (!%p142_p9), %s669_s16, 10 }
  0x10   : > { %s164_s8 = scalar_lea.vmem (!%p142_p9), [#allocation2], %s471_s5  ;;  %s773_s19 = scalar_lea.hbm (!%p142_p9), %s823_s3, %s485_s9 }
  0x11   : > { %s405_s10 = sshll.u32 (!%p142_p9), %s164_s8, 4  ;;  %s779_s16 = scalar_lea.sflag (!%p142_p9), [#allocation3], %s162_s4  ;;  %s775_s10 = int_to_ptr.vmem [resolvable:$true] %s405_s10 }
  0x12   : > { %s561_s20 = scalar_lea.vmem (!%p142_p9), %s775_s10, 1024 }
  0x13   : > { %p562_p11 = scmp.ne.s32.totalorder (!%p142_p9), %s775_s10, %s561_s20 }
  0x15   : > { %s831_s24 = smov (!%p166_p10, %s472_s24), 15  ;;  %p563_p12 = pnand %p562_p11, %p686_p5 }
  0x16   : > { %s473_s25 = sshll.u32 %s831_s24, 3  ;;  %s625_s24 = smov [#allocation2]  }
  0x17   : > { %s169_s28 = scalar_lea.vmem %s820_s0, %s473_s25  ;;  %p564_p13 = pneg %p563_p12 }
  0x18   : > { %v173_v0 = vld [vmem:[%s169_s28] sm:$0xff]  ;;  %v174_v2 = vld [vmem:[%s169_s28 + $0x8] sm:$0xff]  ;;  %v175_v8 = vld [vmem:[%s169_s28 + $0x10] sm:$0xff]  ;;  %s565_s25 = sshll.u32 %s625_s24, 4  ;;  %s566_s25 = int_to_ptr.vmem [resolvable:$false] %s565_s25 }
  0x19   : > { %v177_v1 = vld [vmem:[%s169_s28 + $0x20] sm:$0xff]  ;;  %v182_v3 = vsel %vm181_vm0, %v173_v0, 0.0  ;;  %v178_v5 = vld [vmem:[%s169_s28 + $0x28] sm:$0xff]  ;;  %v185_v6 = vsel %vm181_vm0, %v174_v2, 0.0  ;;  %v176_v9 = vld [vmem:[%s169_s28 + $0x18] sm:$0xff]  ;;  %v188_v10 = vsel %vm181_vm0, %v175_v8, 0.0  ;;  %p568_p0 = scmp.lt.s32.totalorder %s775_s10, %s566_s25 }
  0x1a   : > { %v194_v4 = vsel %vm181_vm0, %v177_v1, 0.0  ;;  %183 = vadd.xlane.f32.xlu0 %v182_v3  ;;  %v197_v7 = vsel %vm181_vm0, %v178_v5, 0.0  ;;  %v191_v11 = vsel %vm181_vm0, %v176_v9, 0.0  ;;  %v179_v12 = vld [vmem:[%s169_s28 + $0x30] sm:$0xff]  ;;  %v180_v13 = vld [vmem:[%s169_s28 + $0x38] sm:$0xff]  ;;  %s567_s26 = scalar_lea.vmem %s566_s25, 2048 }
  0x1b   : > { %195 = vadd.xlane.f32.xlu1 %v194_v4  ;;  %v200_v14 = vsel %vm181_vm0, %v179_v12, 0.0  ;;  %v203_v15 = vsel %vm181_vm0, %v180_v13, 0.0  ;;  %p569_p1 = scmp.lt.s32.totalorder %s567_s26, %s561_s20 }
  0x1d   : > { %p570_p2 = por %p569_p1, %p568_p0 }
  0x1e   : > { %186 = vadd.xlane.f32.xlu0 %v185_v6 }
  0x1f   : > { %198 = vadd.xlane.f32.xlu1 %v197_v7  ;;  %p571_p3 = pnand %p570_p2, %p564_p13 }
  0x22   : > { %189 = vadd.xlane.f32.xlu0 %v188_v10 }
  0x23   : > { %192 = vadd.xlane.f32.xlu1 %v191_v11 }
  0x26   : > { %201 = vadd.xlane.f32.xlu0 %v200_v14 }
  0x27   : > { %204 = vadd.xlane.f32.xlu1 %v203_v15 }
  0xa7   : > { %v184_v16 = vpop.xlane.xlu0 %183 }
  0xa8   : > { %v196_v17 = vpop.xlane.xlu1 %195  ;;  %v207_v18 = vmul.f32 0.0625, %v184_v16 }
  0xa9   : > { %v211_v19 = vmul.f32 0.0625, %v196_v17 }
  0xaa   : > { %v708_v20 = vsub.f32 %v173_v0, %v207_v18 }
  0xab   : > { %v710_v21 = vsub.f32 %v177_v1, %v211_v19  ;;  %v187_v22 = vpop.xlane.xlu0 %186 }
  0xac   : > { %v199_v23 = vpop.xlane.xlu1 %198  ;;  %v208_v24 = vmul.f32 0.0625, %v187_v22  ;;  %v223_v26 = vmul.f32 %v708_v20, %v708_v20 }
  0xad   : > { %v212_v25 = vmul.f32 0.0625, %v199_v23  ;;  %v227_v27 = vmul.f32 %v710_v21, %v710_v21 }
  0xae   : > { %v716_v28 = vsub.f32 %v174_v2, %v208_v24  ;;  %v231_v30 = vsel %vm181_vm0, %v223_v26, 0.0 }
  0xaf   : > { %v718_v29 = vsub.f32 %v178_v5, %v212_v25  ;;  %232 = vadd.xlane.f32.xlu0 %v231_v30  ;;  %v190_v31 = vpop.xlane.xlu0 %189  ;;  %v243_v33 = vsel %vm181_vm0, %v227_v27, 0.0 }
  0xb0   : > { %v193_v32 = vpop.xlane.xlu1 %192  ;;  %v209_v34 = vmul.f32 0.0625, %v190_v31  ;;  %v224_v36 = vmul.f32 %v716_v28, %v716_v28 }
  0xb1   : > { %v210_v35 = vmul.f32 0.0625, %v193_v32  ;;  %v228_v37 = vmul.f32 %v718_v29, %v718_v29 }
  0xb2   : > { %v726_v38 = vsub.f32 %v175_v8, %v209_v34  ;;  %v234_v40 = vsel %vm181_vm0, %v224_v36, 0.0 }
  0xb3   : > { %v728_v39 = vsub.f32 %v176_v9, %v210_v35  ;;  %244 = vadd.xlane.f32.xlu0 %v243_v33  ;;  %235 = vadd.xlane.f32.xlu1 %v234_v40  ;;  %v202_v41 = vpop.xlane.xlu0 %201  ;;  %v246_v43 = vsel %vm181_vm0, %v228_v37, 0.0  ;;  %v474_v37 = vld [vmem:[%s822_s2] ss:$0 sm:$0xff] }
  0xb4   : > { %v205_v42 = vpop.xlane.xlu1 %204  ;;  %v213_v44 = vmul.f32 0.0625, %v202_v41  ;;  %v225_v46 = vmul.f32 %v726_v38, %v726_v38 }
  0xb5   : > { %v214_v45 = vmul.f32 0.0625, %v205_v42  ;;  %v226_v47 = vmul.f32 %v728_v39, %v728_v39 }
  0xb6   : > { %v736_v48 = vsub.f32 %v179_v12, %v213_v44  ;;  %v237_v50 = vsel %vm181_vm0, %v225_v46, 0.0 }
  0xb7   : > { %v738_v49 = vsub.f32 %v180_v13, %v214_v45  ;;  %247 = vadd.xlane.f32.xlu1 %v246_v43  ;;  %238 = vadd.xlane.f32.xlu0 %v237_v50  ;;  %v240_v51 = vsel %vm181_vm0, %v226_v47, 0.0 }
  0xb8   : > { %v229_v52 = vmul.f32 %v736_v48, %v736_v48 }
  0xb9   : > { %v230_v53 = vmul.f32 %v738_v49, %v738_v49 }
  0xba   : > { %v249_v54 = vsel %vm181_vm0, %v229_v52, 0.0 }
  0xbb   : > { %241 = vadd.xlane.f32.xlu1 %v240_v51  ;;  %250 = vadd.xlane.f32.xlu0 %v249_v54  ;;  %v252_v55 = vsel %vm181_vm0, %v230_v53, 0.0 }
  0xbf   : > { %253 = vadd.xlane.f32.xlu1 %v252_v55 }
 0x13c   : > { %v233_v57 = vpop.xlane.xlu0 %232 }
 0x13d   : > { %v255_v58 = vmul.f32 0.0625, %v233_v57 }
 0x13f   : > { %v263_v59 = vadd.f32 1e-05, %v255_v58 }
 0x140   : > { %v236_v60 = vpop.xlane.xlu1 %235  ;;  %v245_v61 = vpop.xlane.xlu0 %244 }
 0x141   : > { %v256_v62 = vmul.f32 0.0625, %v236_v60  ;;  %v259_v63 = vmul.f32 0.0625, %v245_v61  ;;  %545 = vrsqrt.f32 %v263_v59 }
 0x143   : > { %v264_v0 = vadd.f32 1e-05, %v256_v62  ;;  %v267_v1 = vadd.f32 1e-05, %v259_v63 }
 0x144   : > { %v248_v2 = vpop.xlane.xlu1 %247  ;;  %v239_v3 = vpop.xlane.xlu0 %238 }
 0x145   : > { %547 = vrsqrt.f32 %v264_v0  ;;  %v260_v4 = vmul.f32 0.0625, %v248_v2  ;;  %v257_v5 = vmul.f32 0.0625, %v239_v3 }
 0x146   : > { %549 = vrsqrt.f32 %v267_v1 }
 0x147   : > { %v268_v6 = vadd.f32 1e-05, %v260_v4  ;;  %v265_v7 = vadd.f32 1e-05, %v257_v5 }
 0x148   : > { %v242_v8 = vpop.xlane.xlu1 %241  ;;  %v251_v9 = vpop.xlane.xlu0 %250 }
 0x149   : > { %551 = vrsqrt.f32 %v268_v6  ;;  %v258_v10 = vmul.f32 0.0625, %v242_v8  ;;  %v261_v11 = vmul.f32 0.0625, %v251_v9 }
 0x14a   : > { %553 = vrsqrt.f32 %v265_v7 }
 0x14b   : > { %v266_v12 = vadd.f32 1e-05, %v258_v10  ;;  %v269_v13 = vadd.f32 1e-05, %v261_v11  ;;  %v546_v15 = vpop.eup %545 }
 0x14c   : > { %v254_v14 = vpop.xlane.xlu1 %253  ;;  %v279_v19 = vmul.f32 %v546_v15, %v708_v20 }
 0x14d   : > { %555 = vrsqrt.f32 %v266_v12  ;;  %v262_v16 = vmul.f32 0.0625, %v254_v14 }
 0x14e   : > { %557 = vrsqrt.f32 %v269_v13 }
 0x14f   : > { %v548_v17 = vpop.eup %547  ;;  %v270_v18 = vadd.f32 1e-05, %v262_v16 }
 0x150   : > { %v280_v22 = vmul.f32 %v548_v17, %v716_v28  ;;  %v550_v23 = vpop.eup %549 }
 0x151   : > { %559 = vrsqrt.f32 %v270_v18  ;;  %v283_v26 = vmul.f32 %v550_v23, %v710_v21 }
 0x152   : > { %v287_v24 = vpack.c.bf16 %v280_v22, %v279_v19 }
 0x153   : > { %v552_v25 = vpop.eup %551 }
 0x154   : > { %493 = vmatprep.mubr.msk.bf16.mxu0 %vm181_vm0, %v287_v24  ;;  %v284_v27 = vmul.f32 %v552_v25, %v718_v29  ;;  %v554_v30 = vpop.eup %553 }
 0x155   : > { %v281_v20 = vmul.f32 %v554_v30, %v726_v38 }
 0x156   : > { %v289_v31 = vpack.c.bf16 %v284_v27, %v283_v26 }
 0x157   : > { %v556_v32 = vpop.eup %555 }
 0x158   : > { %497 = vmatprep.mubr.msk.bf16.mxu1 %vm181_vm0, %v289_v31  ;;  %v282_v28 = vmul.f32 %v556_v32, %v728_v39  ;;  %v558_v33 = vpop.eup %557 }
 0x159   : > { %v285_v21 = vmul.f32 %v558_v33, %v736_v48 }
 0x15a   : > { %v288_v34 = vpack.c.bf16 %v282_v28, %v281_v20 }
 0x15b   : > { %v560_v35 = vpop.eup %559 }
 0x15c   : > { %494 = vmatmul.mubr.msk.bf16.vlgmr.msra.gmra.mrb[0].mxu0 %vm181_vm0, %v288_v34  ;;  %v286_v36 = vmul.f32 %v560_v35, %v738_v49 }
 0x15e   : > { %v290_v29 = vpack.c.bf16 %v286_v36, %v285_v21 }
 0x160   : > { %498 = vmatmul.mubr.msk.bf16.vlgmr.msra.gmra.mrb[0].mxu1 %vm181_vm0, %v290_v29 }
 0x22f   : > { %v495_v38 = vpop.f32.mrb[0].mxu0 }
 0x230   : > { %v361_v39 = vadd.f32 %v495_v38, %v474_v37  ;;  %v352_v40 = vpop.f32.mrb[1].mxu0 }
 0x231   : > { %v353_v41 = vadd.f32 %v474_v37, %v352_v40  ;;  %v496_v42 = vpop.f32.mrb[2].mxu0 }
 0x232   : > { %385 = vst [vmem:[%s164_s8 + $0x10] sm:$0xff] %v361_v39  ;;  %v364_v43 = vadd.f32 %v496_v42, %v474_v37  ;;  %v355_v44 = vpop.f32.mrb[3].mxu0 }
 0x233   : > { %383 = vst [vmem:[%s164_s8] sm:$0xff] %v353_v41  ;;  %v356_v45 = vadd.f32 %v474_v37, %v355_v44  ;;  %v499_v46 = vpop.f32.mrb[0].mxu1 }
 0x234   : > { %386 = vst [vmem:[%s164_s8 + $0x18] sm:$0xff] %v364_v43  ;;  %v377_v47 = vadd.f32 %v499_v46, %v474_v37  ;;  %v368_v48 = vpop.f32.mrb[1].mxu1 }
 0x235   : > { %384 = vst [vmem:[%s164_s8 + $0x8] sm:$0xff] %v356_v45  ;;  %v369_v49 = vadd.f32 %v474_v37, %v368_v48  ;;  %v500_v50 = vpop.f32.mrb[2].mxu1 }
 0x236   : > { %389 = vst [vmem:[%s164_s8 + $0x30] sm:$0xff] %v377_v47  ;;  %v380_v51 = vadd.f32 %v500_v50, %v474_v37  ;;  %v371_v52 = vpop.f32.mrb[3].mxu1 }
 0x237   : > { %387 = vst [vmem:[%s164_s8 + $0x20] sm:$0xff] %v369_v49  ;;  %v372_v53 = vadd.f32 %v474_v37, %v371_v52 }
 0x238   : > { %390 = vst [vmem:[%s164_s8 + $0x38] sm:$0xff] %v380_v51 }
 0x239   : > { %388 = vst [vmem:[%s164_s8 + $0x28] sm:$0xff] %v372_v53 }
 0x23a   : > { %574 = shalt.err (!%p571_p3)
}
 0x23b   : > { %s575_s27 = scalar_lea.hbm %s773_s19, 1024  ;;  %s579_s30 = scalar_lea.hbm %s823_s3, 2048 }
 0x23c   : > { %p576_p4 = scmp.ne.s32.totalorder %s773_s19, %s575_s27  ;;  %p580_p9 = scmp.lt.u32.totalorder %s773_s19, %s823_s3 }
 0x23d   : > { %p581_p10 = scmp.lt.u32.totalorder %s579_s30, %s575_s27  ;;  %p583_p12 = scmp.lt.u32.totalorder %s575_s27, %s773_s19 }
 0x23e   : > { %p577_p7 = pnand %p576_p4, %p686_p5 }
 0x23f   : > { %p582_p11 = por %p581_p10, %p580_p9 }
 0x240   : > { %p578_p8 = pneg %p577_p7 }
 0x241   : > { %p584_p13 = por %p583_p12, %p582_p11 }
 0x243   : > { %p585_p0 = pnand %p584_p13, %p578_p8 }
 0x245   : > { %588 = shalt.err (!%p585_p0)
}
 0x246   : > { %s626_s6 = smov 128   ;;  %s627_s7 = smov 8  }
 0x247   : > { %503 = dma.vmem_to_hbm [thread:$0]  (%p686_p5), %s775_s10, 1024, %s773_s19, %s779_s16, %s626_s6, %s626_s6, %s627_s7  }
 0x248 PF: > { %p509_p1 = scmp.ge.s32.totalorder %s623_s15, 2  ;;  %s420_s8 = sand.u32 1, %s611_s12  }
 0x249   : > { %s421_s9 = scalar_lea.sflag [#allocation3], %s420_s8 }
 0x24a   : > { %p506_p2 = pnand %p509_p1, %p690_p6 }
 0x24c   : > { %606 = dma.done.wait (!%p506_p2), %s421_s9, 1024  }
 0x24d   : > { %608 = vsyncadd (!%p506_p2), %s421_s9, 4294966272  ;;  %p13_p3 = scmp.ge.s32.totalorder %s673_s18, 4   ;;  %s826_s12 = smov %s615_s13 }
 0x24e   : > { %s827_s13 = smov %s619_s14  ;;  %s828_s14 = smov %s684_s21 }
 0x24f   : > { %s829_s15 = smov %s673_s18  ;;  %15 = sbr.rel (!%p13_p3) target bundleno = 3 (0x3), region = 67 }
 0x256   :  { %426 = vsyncpa [#allocation3], 1 }
 0x257   :  { %428 = vsyncpa [#allocation3 + $0x1], 1 }

</bundles_post_ra>
